<compile_context>
chip_gen: v6e
topology: v6e:2x2x1
jax: 0.10.0
libtpu: 0.0.40
codegen_flags: <defaults>
</compile_context>

<pallas_src>
import jax
import jax.numpy as jnp
from jax.experimental import pallas as pl
from jax.experimental.pallas import tpu as pltpu


def _conv3x3_s2_kernel(xe_ref, xo_ref, xh_ref, w01_ref, w2_ref, b_ref,
                       o_ref, acc_ref):
    """One (batch, row-tile) step of the 3x3 stride-2 conv.

    xe_ref : (TH, Wo+1, 2*Cin)  even padded rows 2*ho        (kh=0 taps)
    xo_ref : (TH, Wo+1, 2*Cin)  odd  padded rows 2*ho+1      (kh=1 taps)
    xh_ref : (Wo+1, 2*Cin)      even padded row 2*(tile_end) (kh=2 halo row)
    w01_ref: (3, 2*Cin, Cout)   kw=0 and kw=1 taps fused along K
    w2_ref : (3, Cin, Cout)     kw=2 tap
    b_ref  : (1, Cout)          bias (f32)
    o_ref  : (TH, Wo, Cout)
    acc_ref: (TH*Wo, Cout) f32 VMEM scratch accumulator
    """
    TH, Wo, Cout = o_ref.shape
    C2 = xe_ref.shape[-1]
    C = C2 // 2

    xe = xe_ref[...]                              # (TH, Wo+1, 2C)
    xo = xo_ref[...]                              # (TH, Wo+1, 2C)
    xh = xh_ref[...][None]                        # (1,  Wo+1, 2C)
    if TH > 1:
        # rows 2*ho+2 for every output row of the tile (shift-by-one + halo)
        x2 = jnp.concatenate([xe[1:], xh], axis=0)
    else:
        x2 = xh

    acc_ref[...] = jnp.zeros_like(acc_ref)
    # kh = 0 / 1 / 2 use even / odd / shifted-even rows; per kh:
    #   one K=2*Cin matmul (kw=0,1 fused) + one K=Cin matmul (kw=2).
    for kh, xr in ((0, xe), (1, xo), (2, x2)):
        a01 = xr[:, :Wo, :].reshape(TH * Wo, C2)
        acc_ref[...] += jnp.dot(a01, w01_ref[kh],
                                preferred_element_type=jnp.float32)
        a2 = xr[:, 1:Wo + 1, :C].reshape(TH * Wo, C)
        acc_ref[...] += jnp.dot(a2, w2_ref[kh],
                                preferred_element_type=jnp.float32)

    out = acc_ref[...] + b_ref[...]
    o_ref[...] = out.reshape(TH, Wo, Cout).astype(o_ref.dtype)


def _avgpool2_s2_kernel(x_ref, o_ref):
    """AvgPool2d(kernel=2, stride=2) on a (TH, 2, Wo, 2C) space-to-depth tile."""
    C = o_ref.shape[-1]
    x = x_ref[...].astype(jnp.float32)            # (TH, 2, Wo, 2C)
    s = x[:, 0] + x[:, 1]                         # (TH, Wo, 2C): row pair sum
    o_ref[...] = ((s[..., :C] + s[..., C:]) * 0.25).astype(o_ref.dtype)


def _largest_divisor_at_most(n, cap):
    cap = max(1, min(n, cap))
    while n % cap:
        cap -= 1
    return cap


def downsample2d(x_nchw, *, use_conv, weight=None, bias=None, padding=1,
                 row_tile=None):
    """Forward pass of Downsample2D. x_nchw: (N, C, H, W)."""
    N, C, H, W = x_nchw.shape
    dt = x_nchw.dtype
    x = jnp.transpose(x_nchw, (0, 2, 3, 1))       # NCHW -> NHWC (boundary glue)

    cparams = pltpu.CompilerParams(
        dimension_semantics=("parallel", "parallel"),
        vmem_limit_bytes=32 * 1024 * 1024,        # safe on v5e/v6e/v7x
    )

    if use_conv:
        Cout = weight.shape[0]
        if padding == 0:
            # forward(): F.pad(h, (0, 1, 0, 1)) then conv with padding=0
            x = jnp.pad(x, ((0, 0), (0, 1), (0, 1), (0, 0)))
        else:
            x = jnp.pad(x, ((0, 0), (padding, padding),
                            (padding, padding), (0, 0)))
        Hp, Wp = x.shape[1], x.shape[2]
        Ho = (Hp - 3) // 2 + 1
        Wo = (Wp - 3) // 2 + 1
        # Pad up to the even space-to-depth layout (at most one zero row/col).
        Hpt, Wpt = 2 * Ho + 2, 2 * Wo + 2
        if Hpt > Hp or Wpt > Wp:
            x = jnp.pad(x, ((0, 0), (0, Hpt - Hp), (0, Wpt - Wp), (0, 0)))
        # Free reshape: (N, 2*(Ho+1), 2*(Wo+1), C) -> (N, Ho+1, 2, Wo+1, 2C).
        x5 = x.reshape(N, Ho + 1, 2, Wo + 1, 2 * C)

        # PyTorch Conv2d weight (Cout, Cin, 3, 3) -> (kh, kw, Cin, Cout),
        # then fuse kw=0,1 along K and keep kw=2 separate.
        w = jnp.transpose(weight, (2, 3, 1, 0)).astype(dt)   # (3, 3, Cin, Cout)
        w01 = jnp.concatenate([w[:, 0], w[:, 1]], axis=1)    # (3, 2*Cin, Cout)
        w2 = w[:, 2]                                         # (3, Cin, Cout)
        b = bias.reshape(1, Cout).astype(jnp.float32)

        if row_tile is None:
            itemsize = jnp.dtype(dt).itemsize
            per_row = (2 * (Wo + 1) * 2 * C * itemsize       # xe + xo rows
                       + Wo * Cout * (4 + itemsize))         # f32 acc + out row
            row_tile = max(1, (4 * 1024 * 1024) // max(1, per_row))
        TH = _largest_divisor_at_most(Ho, row_tile)
        R = Ho // TH

        grid_spec = pltpu.PrefetchScalarGridSpec(
            num_scalar_prefetch=0,
            grid=(N, R),
            in_specs=[
                # even rows of the tile (kh=0)
                pl.BlockSpec((None, TH, None, Wo + 1, 2 * C),
                             lambda n, r: (n, r, 0, 0, 0)),
                # odd rows of the tile (kh=1)
                pl.BlockSpec((None, TH, None, Wo + 1, 2 * C),
                             lambda n, r: (n, r, 1, 0, 0)),
                # one-row even halo just past the tile (kh=2 of last row)
                pl.BlockSpec((None, None, None, Wo + 1, 2 * C),
                             lambda n, r: (n, (r + 1) * TH, 0, 0, 0)),
                pl.BlockSpec((3, 2 * C, Cout), lambda n, r: (0, 0, 0)),
                pl.BlockSpec((3, C, Cout), lambda n, r: (0, 0, 0)),
                pl.BlockSpec((1, Cout), lambda n, r: (0, 0)),
            ],
            out_specs=pl.BlockSpec((None, TH, Wo, Cout),
                                   lambda n, r: (n, r, 0, 0)),
            scratch_shapes=[pltpu.VMEM((TH * Wo, Cout), jnp.float32)],
        )
        out = pl.pallas_call(
            _conv3x3_s2_kernel,
            out_shape=jax.ShapeDtypeStruct((N, Ho, Wo, Cout), dt),
            grid_spec=grid_spec,
            compiler_params=cparams,
        )(x5, x5, x5, w01, w2, b)
    else:
        assert weight is None and bias is None
        Ho, Wo = H // 2, W // 2
        xc = x[:, :2 * Ho, :2 * Wo, :]
        x5 = xc.reshape(N, Ho, 2, Wo, 2 * C)      # free space-to-depth view
        if row_tile is None:
            per_row = 4 * Wo * C * jnp.dtype(dt).itemsize
            row_tile = max(1, (4 * 1024 * 1024) // max(1, per_row))
        TH = _largest_divisor_at_most(Ho, row_tile)
        R = Ho // TH
        out = pl.pallas_call(
            _avgpool2_s2_kernel,
            out_shape=jax.ShapeDtypeStruct((N, Ho, Wo, C), dt),
            grid_spec=pltpu.PrefetchScalarGridSpec(
                num_scalar_prefetch=0,
                grid=(N, R),
                in_specs=[pl.BlockSpec((None, TH, 2, Wo, 2 * C),
                                       lambda n, r: (n, r, 0, 0, 0))],
                out_specs=pl.BlockSpec((None, TH, Wo, C),
                                       lambda n, r: (n, r, 0, 0)),
            ),
            compiler_params=cparams,
        )(x5)

    return jnp.transpose(out, (0, 3, 1, 2))       # NHWC -> NCHW


if __name__ == "__main__":
    key = jax.random.PRNGKey(0)
    k1, k2, k3 = jax.random.split(key, 3)

    N, C, H, W = 2, 4, 16, 16
    Cout = C  # out_channels defaults to channels

    x = jax.random.normal(k1, (N, C, H, W), jnp.float32)
    conv_weight = 0.1 * jax.random.normal(k2, (Cout, C, 3, 3), jnp.float32)
    conv_bias = 0.1 * jax.random.normal(k3, (Cout,), jnp.float32)

    # --- use_conv=True, padding=1 path (auto tile + forced small tiles) ---
    ref_conv = jax.lax.conv_general_dilated(
        x, conv_weight, window_strides=(2, 2), padding=((1, 1), (1, 1)),
        dimension_numbers=("NCHW", "OIHW", "NCHW"),
    ) + conv_bias.reshape(1, Cout, 1, 1)
    for rt in (None, 4, 1):
        y_conv = jax.block_until_ready(downsample2d(
            x, use_conv=True, weight=conv_weight, bias=conv_bias,
            padding=1, row_tile=rt))
        assert y_conv.shape == (N, Cout, H // 2, W // 2)
        assert jnp.allclose(y_conv, ref_conv, atol=1e-4, rtol=1e-4), rt

    # --- use_conv=True, padding=0 path (module's asymmetric (0,1,0,1) pad) ---
    y0 = jax.block_until_ready(downsample2d(
        x, use_conv=True, weight=conv_weight, bias=conv_bias,
        padding=0, row_tile=4))
    ref0 = jax.lax.conv_general_dilated(
        x, conv_weight, window_strides=(2, 2), padding=((0, 1), (0, 1)),
        dimension_numbers=("NCHW", "OIHW", "NCHW"),
    ) + conv_bias.reshape(1, Cout, 1, 1)
    assert jnp.allclose(y0, ref0, atol=1e-4, rtol=1e-4)

    # --- use_conv=False (AvgPool2d) path ---
    y_pool = jax.block_until_ready(downsample2d(x, use_conv=False, row_tile=4))
    ref_pool = jnp.mean(x.reshape(N, C, H // 2, 2, W // 2, 2), axis=(3, 5))
    assert y_pool.shape == (N, C, H // 2, W // 2)
    assert jnp.allclose(y_pool, ref_pool, atol=1e-5, rtol=1e-5)

    print("KERNEL_OK")
</pallas_src>

<mosaic_0001>
module attributes {stable_mosaic.version = 11 : i64} {
  func.func @_conv3x3_s2_kernel(%arg0: i32, %arg1: i32, %arg2: memref<1x8x1x9x8xf32, #tpu.memory_space<vmem>>, %arg3: memref<1x8x1x9x8xf32, #tpu.memory_space<vmem>>, %arg4: memref<1x1x1x9x8xf32, #tpu.memory_space<vmem>>, %arg5: memref<3x8x4xf32, #tpu.memory_space<vmem>>, %arg6: memref<3x4x4xf32, #tpu.memory_space<vmem>>, %arg7: memref<1x4xf32, #tpu.memory_space<vmem>>, %arg8: memref<1x8x8x4xf32, #tpu.memory_space<vmem>>, %arg9: memref<64x4xf32, #tpu.memory_space<vmem>>) attributes {dimension_semantics = [#tpu.dimension_semantics<parallel>, #tpu.dimension_semantics<parallel>], iteration_bounds = array<i64: 2, 1>, scalar_prefetch = 0 : i64, scratch_operands = 1 : i64, tpu.core_type = #tpu.core_type<tc>, window_params = [{transform_indices = @transform_0, window_bounds = array<i64: 1, 8, 1, 9, 8>}, {transform_indices = @transform_1, window_bounds = array<i64: 1, 8, 1, 9, 8>}, {transform_indices = @transform_2, window_bounds = array<i64: 1, 1, 1, 9, 8>}, {pipeline_mode = #tpu.pipeline_mode<synchronous>, transform_indices = @transform_3, window_bounds = array<i64: 3, 8, 4>}, {pipeline_mode = #tpu.pipeline_mode<synchronous>, transform_indices = @transform_4, window_bounds = array<i64: 3, 4, 4>}, {pipeline_mode = #tpu.pipeline_mode<synchronous>, transform_indices = @transform_5, window_bounds = array<i64: 1, 4>}, {transform_indices = @transform_6, window_bounds = array<i64: 1, 8, 8, 4>}]} {
    %c0 = arith.constant 0 : index
    %c0_0 = arith.constant 0 : index
    %c0_1 = arith.constant 0 : index
    %c0_2 = arith.constant 0 : index
    %c0_3 = arith.constant 0 : index
    %0 = vector.load %arg2[%c0, %c0_0, %c0_1, %c0_2, %c0_3] : memref<1x8x1x9x8xf32, #tpu.memory_space<vmem>>, vector<1x8x1x9x8xf32>
    %1 = vector.shape_cast %0 : vector<1x8x1x9x8xf32> to vector<8x9x8xf32>
    %c0_4 = arith.constant 0 : index
    %c0_5 = arith.constant 0 : index
    %c0_6 = arith.constant 0 : index
    %c0_7 = arith.constant 0 : index
    %c0_8 = arith.constant 0 : index
    %2 = vector.load %arg3[%c0_4, %c0_5, %c0_6, %c0_7, %c0_8] : memref<1x8x1x9x8xf32, #tpu.memory_space<vmem>>, vector<1x8x1x9x8xf32>
    %3 = vector.shape_cast %2 : vector<1x8x1x9x8xf32> to vector<8x9x8xf32>
    %c0_9 = arith.constant 0 : index
    %c0_10 = arith.constant 0 : index
    %c0_11 = arith.constant 0 : index
    %c0_12 = arith.constant 0 : index
    %c0_13 = arith.constant 0 : index
    %4 = vector.load %arg4[%c0_9, %c0_10, %c0_11, %c0_12, %c0_13] : memref<1x1x1x9x8xf32, #tpu.memory_space<vmem>>, vector<1x1x1x9x8xf32>
    %5 = vector.shape_cast %4 : vector<1x1x1x9x8xf32> to vector<9x8xf32>
    %6 = vector.shape_cast %5 : vector<9x8xf32> to vector<1x9x8xf32>
    %7 = vector.extract_strided_slice %1 {offsets = [1, 0, 0], sizes = [7, 9, 8], strides = [1, 1, 1]} : vector<8x9x8xf32> to vector<7x9x8xf32>
    %8 = tpu.concatenate %7, %6 in 0 : vector<7x9x8xf32>, vector<1x9x8xf32> -> vector<8x9x8xf32>
    %cst = arith.constant 0.000000e+00 : f32
    %9 = vector.broadcast %cst : f32 to vector<64x4xf32>
    %c0_14 = arith.constant 0 : index
    %c0_15 = arith.constant 0 : index
    %10 = vector.load %arg9[%c0_14, %c0_15] : memref<64x4xf32, #tpu.memory_space<vmem>>, vector<64x4xf32>
    tpu.vector_store %arg9[%c0_14, %c0_15], %9 {strides = array<i32>} : memref<64x4xf32, #tpu.memory_space<vmem>>, vector<64x4xf32>,
    %11 = vector.extract_strided_slice %1 {offsets = [0, 0, 0], sizes = [8, 8, 8], strides = [1, 1, 1]} : vector<8x9x8xf32> to vector<8x8x8xf32>
    %12 = vector.shape_cast %11 : vector<8x8x8xf32> to vector<64x8xf32>
    %c0_16 = arith.constant 0 : index
    %c0_17 = arith.constant 0 : index
    %13 = vector.load %arg9[%c0_16, %c0_17] : memref<64x4xf32, #tpu.memory_space<vmem>>, vector<64x4xf32>
    %c0_18 = arith.constant 0 : index
    %c0_19 = arith.constant 0 : index
    %c0_20 = arith.constant 0 : index
    %14 = vector.load %arg5[%c0_18, %c0_19, %c0_20] : memref<3x8x4xf32, #tpu.memory_space<vmem>>, vector<1x8x4xf32>
    %15 = vector.shape_cast %14 : vector<1x8x4xf32> to vector<8x4xf32>
    %cst_21 = arith.constant dense<0.000000e+00> : vector<64x4xf32>
    %16 = tpu.matmul %12, %15, %cst_21 {dimension_numbers = #tpu.dot_dimension_numbers<[1], [0], [0], [1], [0, 0, 1, 1], [], []>} : vector<64x8xf32>, vector<8x4xf32>, vector<64x4xf32> -> vector<64x4xf32>
    %17 = arith.addf %13, %16 : vector<64x4xf32>
    %c0_22 = arith.constant 0 : index
    %c0_23 = arith.constant 0 : index
    %18 = vector.load %arg9[%c0_22, %c0_23] : memref<64x4xf32, #tpu.memory_space<vmem>>, vector<64x4xf32>
    tpu.vector_store %arg9[%c0_22, %c0_23], %17 {strides = array<i32>} : memref<64x4xf32, #tpu.memory_space<vmem>>, vector<64x4xf32>,
    %19 = vector.extract_strided_slice %1 {offsets = [0, 1, 0], sizes = [8, 8, 4], strides = [1, 1, 1]} : vector<8x9x8xf32> to vector<8x8x4xf32>
    %20 = vector.shape_cast %19 : vector<8x8x4xf32> to vector<64x4xf32>
    %c0_24 = arith.constant 0 : index
    %c0_25 = arith.constant 0 : index
    %21 = vector.load %arg9[%c0_24, %c0_25] : memref<64x4xf32, #tpu.memory_space<vmem>>, vector<64x4xf32>
    %c0_26 = arith.constant 0 : index
    %c0_27 = arith.constant 0 : index
    %c0_28 = arith.constant 0 : index
    %22 = vector.load %arg6[%c0_26, %c0_27, %c0_28] : memref<3x4x4xf32, #tpu.memory_space<vmem>>, vector<1x4x4xf32>
    %23 = vector.shape_cast %22 : vector<1x4x4xf32> to vector<4x4xf32>
    %cst_29 = arith.constant dense<0.000000e+00> : vector<64x4xf32>
    %24 = tpu.matmul %20, %23, %cst_29 {dimension_numbers = #tpu.dot_dimension_numbers<[1], [0], [0], [1], [0, 0, 1, 1], [], []>} : vector<64x4xf32>, vector<4x4xf32>, vector<64x4xf32> -> vector<64x4xf32>
    %25 = arith.addf %21, %24 : vector<64x4xf32>
    %c0_30 = arith.constant 0 : index
    %c0_31 = arith.constant 0 : index
    %26 = vector.load %arg9[%c0_30, %c0_31] : memref<64x4xf32, #tpu.memory_space<vmem>>, vector<64x4xf32>
    tpu.vector_store %arg9[%c0_30, %c0_31], %25 {strides = array<i32>} : memref<64x4xf32, #tpu.memory_space<vmem>>, vector<64x4xf32>,
    %27 = vector.extract_strided_slice %3 {offsets = [0, 0, 0], sizes = [8, 8, 8], strides = [1, 1, 1]} : vector<8x9x8xf32> to vector<8x8x8xf32>
    %28 = vector.shape_cast %27 : vector<8x8x8xf32> to vector<64x8xf32>
    %c0_32 = arith.constant 0 : index
    %c0_33 = arith.constant 0 : index
    %29 = vector.load %arg9[%c0_32, %c0_33] : memref<64x4xf32, #tpu.memory_space<vmem>>, vector<64x4xf32>
    %c1 = arith.constant 1 : index
    %c0_34 = arith.constant 0 : index
    %c0_35 = arith.constant 0 : index
    %30 = vector.load %arg5[%c1, %c0_34, %c0_35] : memref<3x8x4xf32, #tpu.memory_space<vmem>>, vector<1x8x4xf32>
    %31 = vector.shape_cast %30 : vector<1x8x4xf32> to vector<8x4xf32>
    %cst_36 = arith.constant dense<0.000000e+00> : vector<64x4xf32>
    %32 = tpu.matmul %28, %31, %cst_36 {dimension_numbers = #tpu.dot_dimension_numbers<[1], [0], [0], [1], [0, 0, 1, 1], [], []>} : vector<64x8xf32>, vector<8x4xf32>, vector<64x4xf32> -> vector<64x4xf32>
    %33 = arith.addf %29, %32 : vector<64x4xf32>
    %c0_37 = arith.constant 0 : index
    %c0_38 = arith.constant 0 : index
    %34 = vector.load %arg9[%c0_37, %c0_38] : memref<64x4xf32, #tpu.memory_space<vmem>>, vector<64x4xf32>
    tpu.vector_store %arg9[%c0_37, %c0_38], %33 {strides = array<i32>} : memref<64x4xf32, #tpu.memory_space<vmem>>, vector<64x4xf32>,
    %35 = vector.extract_strided_slice %3 {offsets = [0, 1, 0], sizes = [8, 8, 4], strides = [1, 1, 1]} : vector<8x9x8xf32> to vector<8x8x4xf32>
    %36 = vector.shape_cast %35 : vector<8x8x4xf32> to vector<64x4xf32>
    %c0_39 = arith.constant 0 : index
    %c0_40 = arith.constant 0 : index
    %37 = vector.load %arg9[%c0_39, %c0_40] : memref<64x4xf32, #tpu.memory_space<vmem>>, vector<64x4xf32>
    %c1_41 = arith.constant 1 : index
    %c0_42 = arith.constant 0 : index
    %c0_43 = arith.constant 0 : index
    %38 = vector.load %arg6[%c1_41, %c0_42, %c0_43] : memref<3x4x4xf32, #tpu.memory_space<vmem>>, vector<1x4x4xf32>
    %39 = vector.shape_cast %38 : vector<1x4x4xf32> to vector<4x4xf32>
    %cst_44 = arith.constant dense<0.000000e+00> : vector<64x4xf32>
    %40 = tpu.matmul %36, %39, %cst_44 {dimension_numbers = #tpu.dot_dimension_numbers<[1], [0], [0], [1], [0, 0, 1, 1], [], []>} : vector<64x4xf32>, vector<4x4xf32>, vector<64x4xf32> -> vector<64x4xf32>
    %41 = arith.addf %37, %40 : vector<64x4xf32>
    %c0_45 = arith.constant 0 : index
    %c0_46 = arith.constant 0 : index
    %42 = vector.load %arg9[%c0_45, %c0_46] : memref<64x4xf32, #tpu.memory_space<vmem>>, vector<64x4xf32>
    tpu.vector_store %arg9[%c0_45, %c0_46], %41 {strides = array<i32>} : memref<64x4xf32, #tpu.memory_space<vmem>>, vector<64x4xf32>,
    %43 = vector.extract_strided_slice %8 {offsets = [0, 0, 0], sizes = [8, 8, 8], strides = [1, 1, 1]} : vector<8x9x8xf32> to vector<8x8x8xf32>
    %44 = vector.shape_cast %43 : vector<8x8x8xf32> to vector<64x8xf32>
    %c0_47 = arith.constant 0 : index
    %c0_48 = arith.constant 0 : index
    %45 = vector.load %arg9[%c0_47, %c0_48] : memref<64x4xf32, #tpu.memory_space<vmem>>, vector<64x4xf32>
    %c2 = arith.constant 2 : index
    %c0_49 = arith.constant 0 : index
    %c0_50 = arith.constant 0 : index
    %46 = vector.load %arg5[%c2, %c0_49, %c0_50] : memref<3x8x4xf32, #tpu.memory_space<vmem>>, vector<1x8x4xf32>
    %47 = vector.shape_cast %46 : vector<1x8x4xf32> to vector<8x4xf32>
    %cst_51 = arith.constant dense<0.000000e+00> : vector<64x4xf32>
    %48 = tpu.matmul %44, %47, %cst_51 {dimension_numbers = #tpu.dot_dimension_numbers<[1], [0], [0], [1], [0, 0, 1, 1], [], []>} : vector<64x8xf32>, vector<8x4xf32>, vector<64x4xf32> -> vector<64x4xf32>
    %49 = arith.addf %45, %48 : vector<64x4xf32>
    %c0_52 = arith.constant 0 : index
    %c0_53 = arith.constant 0 : index
    %50 = vector.load %arg9[%c0_52, %c0_53] : memref<64x4xf32, #tpu.memory_space<vmem>>, vector<64x4xf32>
    tpu.vector_store %arg9[%c0_52, %c0_53], %49 {strides = array<i32>} : memref<64x4xf32, #tpu.memory_space<vmem>>, vector<64x4xf32>,
    %51 = vector.extract_strided_slice %8 {offsets = [0, 1, 0], sizes = [8, 8, 4], strides = [1, 1, 1]} : vector<8x9x8xf32> to vector<8x8x4xf32>
    %52 = vector.shape_cast %51 : vector<8x8x4xf32> to vector<64x4xf32>
    %c0_54 = arith.constant 0 : index
    %c0_55 = arith.constant 0 : index
    %53 = vector.load %arg9[%c0_54, %c0_55] : memref<64x4xf32, #tpu.memory_space<vmem>>, vector<64x4xf32>
    %c2_56 = arith.constant 2 : index
    %c0_57 = arith.constant 0 : index
    %c0_58 = arith.constant 0 : index
    %54 = vector.load %arg6[%c2_56, %c0_57, %c0_58] : memref<3x4x4xf32, #tpu.memory_space<vmem>>, vector<1x4x4xf32>
    %55 = vector.shape_cast %54 : vector<1x4x4xf32> to vector<4x4xf32>
    %cst_59 = arith.constant dense<0.000000e+00> : vector<64x4xf32>
    %56 = tpu.matmul %52, %55, %cst_59 {dimension_numbers = #tpu.dot_dimension_numbers<[1], [0], [0], [1], [0, 0, 1, 1], [], []>} : vector<64x4xf32>, vector<4x4xf32>, vector<64x4xf32> -> vector<64x4xf32>
    %57 = arith.addf %53, %56 : vector<64x4xf32>
    %c0_60 = arith.constant 0 : index
    %c0_61 = arith.constant 0 : index
    %58 = vector.load %arg9[%c0_60, %c0_61] : memref<64x4xf32, #tpu.memory_space<vmem>>, vector<64x4xf32>
    tpu.vector_store %arg9[%c0_60, %c0_61], %57 {strides = array<i32>} : memref<64x4xf32, #tpu.memory_space<vmem>>, vector<64x4xf32>,
    %c0_62 = arith.constant 0 : index
    %c0_63 = arith.constant 0 : index
    %59 = vector.load %arg9[%c0_62, %c0_63] : memref<64x4xf32, #tpu.memory_space<vmem>>, vector<64x4xf32>
    %c0_64 = arith.constant 0 : index
    %c0_65 = arith.constant 0 : index
    %60 = vector.load %arg7[%c0_64, %c0_65] : memref<1x4xf32, #tpu.memory_space<vmem>>, vector<1x4xf32>
    %61 = vector.broadcast %60 : vector<1x4xf32> to vector<64x4xf32>
    %62 = arith.addf %59, %61 : vector<64x4xf32>
    %63 = vector.shape_cast %62 : vector<64x4xf32> to vector<8x8x4xf32>
    %c0_66 = arith.constant 0 : index
    %c0_67 = arith.constant 0 : index
    %c0_68 = arith.constant 0 : index
    %c0_69 = arith.constant 0 : index
    %64 = vector.load %arg8[%c0_66, %c0_67, %c0_68, %c0_69] : memref<1x8x8x4xf32, #tpu.memory_space<vmem>>, vector<1x8x8x4xf32>
    %65 = vector.shape_cast %64 : vector<1x8x8x4xf32> to vector<8x8x4xf32>
    %66 = vector.shape_cast %63 : vector<8x8x4xf32> to vector<1x8x8x4xf32>
    tpu.vector_store %arg8[%c0_66, %c0_67, %c0_68, %c0_69], %66 {strides = array<i32>} : memref<1x8x8x4xf32, #tpu.memory_space<vmem>>, vector<1x8x8x4xf32>,
    return
  }
  func.func @transform_0(%arg0: i32, %arg1: i32) -> (i32, i32, i32, i32, i32) {
    %c0_i32 = arith.constant 0 : i32
    %c0_i32_0 = arith.constant 0 : i32
    %c0_i32_1 = arith.constant 0 : i32
    %c0_i32_2 = arith.constant 0 : i32
    return %arg0, %arg1, %c0_i32, %c0_i32_0, %c0_i32_1 : i32, i32, i32, i32, i32
  }
  func.func @transform_1(%arg0: i32, %arg1: i32) -> (i32, i32, i32, i32, i32) {
    %c1_i32 = arith.constant 1 : i32
    %c0_i32 = arith.constant 0 : i32
    %c0_i32_0 = arith.constant 0 : i32
    %c0_i32_1 = arith.constant 0 : i32
    return %arg0, %arg1, %c1_i32, %c0_i32, %c0_i32_0 : i32, i32, i32, i32, i32
  }
  func.func @transform_2(%arg0: i32, %arg1: i32) -> (i32, i32, i32, i32, i32) {
    %c1_i32 = arith.constant 1 : i32
    %0 = arith.addi %arg1, %c1_i32 : i32
    %c8_i32 = arith.constant 8 : i32
    %1 = arith.muli %0, %c8_i32 : i32
    %c0_i32 = arith.constant 0 : i32
    %c0_i32_0 = arith.constant 0 : i32
    %c0_i32_1 = arith.constant 0 : i32
    %c0_i32_2 = arith.constant 0 : i32
    return %arg0, %1, %c0_i32, %c0_i32_0, %c0_i32_1 : i32, i32, i32, i32, i32
  }
  func.func @transform_3(%arg0: i32, %arg1: i32) -> (i32, i32, i32) {
    %c0_i32 = arith.constant 0 : i32
    %c0_i32_0 = arith.constant 0 : i32
    %c0_i32_1 = arith.constant 0 : i32
    %c0_i32_2 = arith.constant 0 : i32
    return %c0_i32, %c0_i32_0, %c0_i32_1 : i32, i32, i32
  }
  func.func @transform_4(%arg0: i32, %arg1: i32) -> (i32, i32, i32) {
    %c0_i32 = arith.constant 0 : i32
    %c0_i32_0 = arith.constant 0 : i32
    %c0_i32_1 = arith.constant 0 : i32
    %c0_i32_2 = arith.constant 0 : i32
    return %c0_i32, %c0_i32_0, %c0_i32_1 : i32, i32, i32
  }
  func.func @transform_5(%arg0: i32, %arg1: i32) -> (i32, i32) {
    %c0_i32 = arith.constant 0 : i32
    %c0_i32_0 = arith.constant 0 : i32
    %c0_i32_1 = arith.constant 0 : i32
    return %c0_i32, %c0_i32_0 : i32, i32
  }
  func.func @transform_6(%arg0: i32, %arg1: i32) -> (i32, i32, i32, i32) {
    %c0_i32 = arith.constant 0 : i32
    %c0_i32_0 = arith.constant 0 : i32
    %c0_i32_1 = arith.constant 0 : i32
    return %arg0, %arg1, %c0_i32, %c0_i32_0 : i32, i32, i32, i32
  }
}

</mosaic_0001>

<bundles_post_ra>
// kernel: tpu_custom_call.1
= control target key start
LH: loop header
LB: loop body
LE: loop exit
PB: predicated region body
PF: predicated region fallthrough
CT: control target
= control target key end

     0   :  { %s2433_s21 = smov 0   ;;  %s2435_s22 = smov 0   ;;  %s2898_s0 = inlined_call_operand.vmem [shape: f32[2,9,2,9,8], index: 0, kind: input, shape index: {}]   ;;  %s2899_s1 = inlined_call_operand.vmem [shape: f32[2,9,2,9,8], index: 1, kind: input, shape index: {}]   ;;  %s2900_s2 = inlined_call_operand.vmem [shape: f32[2,9,2,9,8], index: 2, kind: input, shape index: {}]   ;;  %s2901_s3 = inlined_call_operand.vmem [shape: f32[3,8,4], index: 3, kind: input, shape index: {}]   ;;  %s2902_s4 = inlined_call_operand.vmem [shape: f32[3,4,4], index: 4, kind: input, shape index: {}]   ;;  %s2903_s5 = inlined_call_operand.vmem [shape: f32[1,4], index: 5, kind: input, shape index: {}]   ;;  %s2904_s6 = inlined_call_operand.vmem [shape: f32[2,8,8,4], index: 6, kind: output, shape index: {}]  }
   0x1   :  { %s2437_s23 = smov 0   ;;  %s2439_s24 = smov 0  }
   0x2   :  { %s2441_s25 = smov 0  }
   0x3 LB: > { %s28_s26 = sadd.s32 1, %s2379_s24  ;;  %p44_p1 = scmp.ne.s32.totalorder %s2371_s22, %s2367_s21  ;;  %s2383_s25 = sphi %s2441_s25, %s16_s25   ;;  %s2379_s24 = sphi %s2439_s24, %s2911_s24   ;;  %s2375_s23 = sphi %s2437_s23, %s2910_s23   ;;  %s2371_s22 = sphi %s2435_s22, %s2909_s22   ;;  %s2367_s21 = sphi %s2433_s21, %s2908_s21  }
   0x4   : > { %p30_p0 = scmp.ge.s32.totalorder %s28_s26, 2  ;;  %p45_p2 = scmp.eq.s32.totalorder %s2383_s25, 0 }
   0x5   : > { %s37_s29 = sadd.s32 1, %s2371_s22  ;;  %p1977_p5 = scmp.ge.s32.totalorder %s2383_s25, 2 }
   0x6   : > { %s2913_s26 = smov (%p30_p0, %s28_s26), 0  ;;  %p2464_p3 = por %p45_p2, %p44_p1 }
   0x7   : > { %s32_s28 = ssub.s32 %s2379_s24, %s2913_s26  ;;  %230 = sbr.rel (%p1977_p5) target bundleno = 41 (0x29), region = 28 }
   0x8   : > { %p35_p4 = scmp.eq.s32.totalorder %s32_s28, 0 }
   0xa   : > { %s2472_s30 = scalar_select %p35_p4, %s2371_s22, %s37_s29  }
   0xc   : > { %233 = sbr.rel (!%p2464_p3) target bundleno = 26 (0x1a), region = 32  ;;  %s235_s7 = sand.u32 (%p2464_p3), 1, %s2371_s22  }
   0xd   : > { %s2205_s8 = smul.u32 (%p2464_p3), 288, %s2379_s24  ;;  %s1978_s9 = sshll.u32 (%p2464_p3), %s235_s7, 7 }
   0xe   : > { %s2484_s13 = scalar_lea.vmem (%p2464_p3), [#allocation3], %s1978_s9   ;;  %s2486_s14 = smov (%p2464_p3), 0  }
   0xf   : > { %s2482_s12 = scalar_lea.vmem (%p2464_p3), %s2898_s0, %s2205_s8  }
  0x11 LB: >> { %v347_v0 = vld [vmem:[%s2482_s12] sm:$0xff]  ;;  %v363_v8 = vld [vmem:[%s2482_s12 + $0x8] sm:$0xff]  ;;  %s341_s14 = sadd.s32 1, %s2387_s14   ;;  %s2387_s14 = sphi %s2486_s14, %s341_s14  }
  0x12   : >> { %v349_v1 = vld [vmem:[%s2482_s12 + $0x20] sm:$0xff]  ;;  %348 = vst [vmem:[%s2484_s13] sm:$0xff] %v347_v0  ;;  %364 = vst [vmem:[%s2484_s13 + $0x8] sm:$0xff] %v363_v8  ;;  %v365_v9 = vld [vmem:[%s2482_s12 + $0x28] sm:$0xff]  ;;  %p340_p6 = scmp.ge.s32.totalorder %s341_s14, 1 }
  0x13   : >> { %v351_v2 = vld [vmem:[%s2482_s12 + $0x40] sm:$0xff]  ;;  %350 = vst [vmem:[%s2484_s13 + $0x10] sm:$0xff] %v349_v1  ;;  %v367_v10 = vld [vmem:[%s2482_s12 + $0x48] sm:$0xff]  ;;  %366 = vst [vmem:[%s2484_s13 + $0x18] sm:$0xff] %v365_v9 }
  0x14   : >> { %352 = vst [vmem:[%s2484_s13 + $0x20] sm:$0xff] %v351_v2  ;;  %v353_v3 = vld [vmem:[%s2482_s12 + $0x60] sm:$0xff]  ;;  %v369_v11 = vld [vmem:[%s2482_s12 + $0x68] sm:$0xff]  ;;  %368 = vst [vmem:[%s2484_s13 + $0x28] sm:$0xff] %v367_v10 }
  0x15   : >> { %v355_v4 = vld [vmem:[%s2482_s12 + $0x80] sm:$0xff]  ;;  %354 = vst [vmem:[%s2484_s13 + $0x30] sm:$0xff] %v353_v3  ;;  %370 = vst [vmem:[%s2484_s13 + $0x38] sm:$0xff] %v369_v11  ;;  %v371_v12 = vld [vmem:[%s2482_s12 + $0x88] sm:$0xff]  ;;  %343 = sbr.rel (!%p340_p6) target bundleno = 17 (0x11), region = 214 }
  0x16   : >> { %v357_v5 = vld [vmem:[%s2482_s12 + $0xa0] sm:$0xff]  ;;  %356 = vst [vmem:[%s2484_s13 + $0x40] sm:$0xff] %v355_v4  ;;  %v373_v13 = vld [vmem:[%s2482_s12 + $0xa8] sm:$0xff]  ;;  %372 = vst [vmem:[%s2484_s13 + $0x48] sm:$0xff] %v371_v12 }
  0x17   : >> { %358 = vst [vmem:[%s2484_s13 + $0x50] sm:$0xff] %v357_v5  ;;  %v359_v6 = vld [vmem:[%s2482_s12 + $0xc0] sm:$0xff]  ;;  %v375_v14 = vld [vmem:[%s2482_s12 + $0xc8] sm:$0xff]  ;;  %374 = vst [vmem:[%s2484_s13 + $0x58] sm:$0xff] %v373_v13 }
  0x18   : >> { %v361_v7 = vld [vmem:[%s2482_s12 + $0xe0] sm:$0xff]  ;;  %360 = vst [vmem:[%s2484_s13 + $0x60] sm:$0xff] %v359_v6  ;;  %376 = vst [vmem:[%s2484_s13 + $0x68] sm:$0xff] %v375_v14  ;;  %v377_v15 = vld [vmem:[%s2482_s12 + $0xe8] sm:$0xff] }
  0x19   : >> { %362 = vst [vmem:[%s2484_s13 + $0x70] sm:$0xff] %v361_v7  ;;  %378 = vst [vmem:[%s2484_s13 + $0x78] sm:$0xff] %v377_v15 }
  0x1a PF: > { %418 = sbr.rel (!%p2464_p3) target bundleno = 41 (0x29), region = 84  ;;  %s420_s15 = sand.u32 (%p2464_p3), 1, %s2371_s22  }
  0x1b   : > { %s1989_s16 = smul.u32 (%p2464_p3), 288, %s2379_s24  ;;  %s1988_s17 = sshll.u32 (%p2464_p3), %s420_s15, 7 }
  0x1c   : > { %s2536_s29 = scalar_lea.vmem (%p2464_p3), [#allocation4], %s1988_s17   ;;  %s2542_s27 = smov (%p2464_p3), 0  }
  0x1d   : > { %s2533_s20 = scalar_lea.vmem (%p2464_p3), %s2899_s1, %s1989_s16 }
  0x1e   : > { %s1807_s28 = scalar_lea.vmem (%p2464_p3), %s2533_s20, 16  }
  0x1f   : > { %s2906_s7 = smov %s1807_s28 }
  0x20 LB: >> { %v533_v16 = vld [vmem:[%s2391_s7] sm:$0xff]  ;;  %v549_v24 = vld [vmem:[%s2391_s7 + $0x8] sm:$0xff]  ;;  %s527_s27 = sadd.s32 1, %s2395_s27   ;;  %s2395_s27 = sphi %s2542_s27, %s527_s27   ;;  %s2391_s7 = sphi %s2906_s7, %s2907_s7  }
  0x21   : >> { %v535_v17 = vld [vmem:[%s2391_s7 + $0x20] sm:$0xff]  ;;  %534 = vst [vmem:[%s2536_s29] sm:$0xff] %v533_v16  ;;  %550 = vst [vmem:[%s2536_s29 + $0x8] sm:$0xff] %v549_v24  ;;  %v551_v25 = vld [vmem:[%s2391_s7 + $0x28] sm:$0xff]  ;;  %p526_p7 = scmp.ge.s32.totalorder %s527_s27, 1 }
  0x22   : >> { %v537_v18 = vld [vmem:[%s2391_s7 + $0x40] sm:$0xff]  ;;  %536 = vst [vmem:[%s2536_s29 + $0x10] sm:$0xff] %v535_v17  ;;  %v553_v26 = vld [vmem:[%s2391_s7 + $0x48] sm:$0xff]  ;;  %552 = vst [vmem:[%s2536_s29 + $0x18] sm:$0xff] %v551_v25 }
  0x23   : >> { %538 = vst [vmem:[%s2536_s29 + $0x20] sm:$0xff] %v537_v18  ;;  %v539_v19 = vld [vmem:[%s2391_s7 + $0x60] sm:$0xff]  ;;  %v555_v27 = vld [vmem:[%s2391_s7 + $0x68] sm:$0xff]  ;;  %554 = vst [vmem:[%s2536_s29 + $0x28] sm:$0xff] %v553_v26 }
  0x24   : >> { %v541_v20 = vld [vmem:[%s2391_s7 + $0x80] sm:$0xff]  ;;  %540 = vst [vmem:[%s2536_s29 + $0x30] sm:$0xff] %v539_v19  ;;  %556 = vst [vmem:[%s2536_s29 + $0x38] sm:$0xff] %v555_v27  ;;  %v557_v28 = vld [vmem:[%s2391_s7 + $0x88] sm:$0xff]  ;;  %529 = sbr.rel (!%p526_p7) target bundleno = 32 (0x20), region = 236 }
  0x25   : >> { %v543_v21 = vld [vmem:[%s2391_s7 + $0xa0] sm:$0xff]  ;;  %542 = vst [vmem:[%s2536_s29 + $0x40] sm:$0xff] %v541_v20  ;;  %v559_v29 = vld [vmem:[%s2391_s7 + $0xa8] sm:$0xff]  ;;  %558 = vst [vmem:[%s2536_s29 + $0x48] sm:$0xff] %v557_v28 }
  0x26   : >> { %544 = vst [vmem:[%s2536_s29 + $0x50] sm:$0xff] %v543_v21  ;;  %v545_v22 = vld [vmem:[%s2391_s7 + $0xc0] sm:$0xff]  ;;  %v561_v30 = vld [vmem:[%s2391_s7 + $0xc8] sm:$0xff]  ;;  %560 = vst [vmem:[%s2536_s29 + $0x58] sm:$0xff] %v559_v29 }
  0x27   : >> { %v547_v23 = vld [vmem:[%s2391_s7 + $0xe0] sm:$0xff]  ;;  %546 = vst [vmem:[%s2536_s29 + $0x60] sm:$0xff] %v545_v22  ;;  %562 = vst [vmem:[%s2536_s29 + $0x68] sm:$0xff] %v561_v30  ;;  %v563_v31 = vld [vmem:[%s2391_s7 + $0xe8] sm:$0xff]  ;;  %s2907_s7 = smov %s1807_s28 }
  0x28   : >> { %548 = vst [vmem:[%s2536_s29 + $0x70] sm:$0xff] %v547_v23  ;;  %564 = vst [vmem:[%s2536_s29 + $0x78] sm:$0xff] %v563_v31 }
  0x29 PF: > { %p2000_p8 = scmp.ge.s32.totalorder %s2383_s25, 1  ;;  %p619_p9 = scmp.lt.s32.totalorder %s2383_s25, 3 }
  0x2b   : > { %p620_p10 = pnand %p2000_p8, %p619_p9 }
  0x2c   : > { %s626_s10 = sand.u32 (!%p620_p10), 1, %s2367_s21   ;;  %p695_p11 = scmp.lt.s32.totalorder (!%p620_p10), %s2375_s23, 1 }
  0x2d   : > { %623 = sbr.rel (%p620_p10) target bundleno = 325 (0x145), region = 140  ;;  %s2601_s15 = sshll.u32 (!%p620_p10), %s626_s10, 7 }
  0x2e   : > { %s2608_s21 = scalar_lea.vmem (!%p620_p10), [#allocation3], %s2601_s15  ;;  %s2698_s29 = scalar_lea.vmem (!%p620_p10), [#allocation4], %s2601_s15 }
  0x32   : > { %v767_v32 = vld [vmem:[%s2901_s3] sm:$0xff]  ;;  %v2023_v33 = vld [vmem:[%s2901_s3 + $0x8] sm:$0xff]  ;;  %vm768_vm0 = vcmask 64512   ;;  %vm972_vm1 = vcmask 1043456   ;;  %vm750_vm2 = vcmask 31744   ;;  %v2612_v37 = vld [vmem:[%s2608_s21 + $0x10] sm:$0xff] }
  0x33   : > { %v955_v34 = vld [vmem:[%s2902_s4] sm:$0xf]  ;;  %2121 = vmatprep.subr.mxu0 %v767_v32  ;;  %v2032_v35 = vld [vmem:[%s2902_s4 + $0x4] sm:$0xf]  ;;  %v2397_v39 = vmov 0.0   ;;  %v2631_v41 = vld [vmem:[%s2901_s3 + $0x10] sm:$0xff] }
  0x34   : > { %2122 = vmatpush3.msra.mxu0 %v767_v32  ;;  %2135 = vmatprep.subr.msk.mxu1 %vm972_vm1, %v955_v34  ;;  %v716_v36 = vld [vmem:[%s2608_s21] sm:$0xff]  ;;  %752 = vst.msk [vmem:[#allocation2 + $0x8] sm:$0xff] %vm750_vm2, %v2397_v39  ;;  %751 = vst.msk [vmem:[#allocation2] sm:$0xff] %vm750_vm2, %v2397_v39  ;;  %v926_v42 = vrot.slane %v2612_v37, 1  ;;  %v717_v44 = vld [vmem:[%s2608_s21 + $0x8] sm:$0x1] }
  0x35   : > { %v2615_v38 = vld [vmem:[%s2608_s21 + $0x20] sm:$0xff]  ;;  %2149 = vmatprep.subr.mxu0 %v2023_v33  ;;  %2136 = vmatpush3.msk.msra.mxu1 %vm972_vm1, %v955_v34  ;;  %753 = vst.msk [vmem:[#allocation2 + $0x10] sm:$0xff] %vm750_vm2, %v2397_v39  ;;  %754 = vst.msk [vmem:[#allocation2 + $0x18] sm:$0xff] %vm750_vm2, %v2397_v39  ;;  %v923_v40 = vrot.slane %v716_v36, 1  ;;  %vm922_vm3 = vcmask 1046528   ;;  %v2641_v45 = vld [vmem:[%s2608_s21 + $0x30] sm:$0xff] }
  0x36   : > { %755 = vst.msk [vmem:[#allocation2 + $0x20] sm:$0xff] %vm750_vm2, %v2397_v39  ;;  %756 = vst.msk [vmem:[#allocation2 + $0x28] sm:$0xff] %vm750_vm2, %v2397_v39  ;;  %2123 = vmatprep.mubr.msk.f32.mxu0 %vm768_vm0, %v716_v36  ;;  %2163 = vmatprep.subr.msk.mxu1 %vm972_vm1, %v2032_v35  ;;  %v929_v43 = vrot.slane %v2615_v38, 1  ;;  %v924_v46 = vrot.slane %v717_v44, 1  ;;  %v719_v47 = vld [vmem:[%s2608_s21 + $0x18] sm:$0x1] }
  0x37   : > { %757 = vst.msk [vmem:[#allocation2 + $0x30] sm:$0xff] %vm750_vm2, %v2397_v39  ;;  %758 = vst.msk [vmem:[#allocation2 + $0x38] sm:$0xff] %vm750_vm2, %v2397_v39  ;;  %2124 = vmatmul.mubr.msk.f32.vlgmr.msra.gmra.mxu0 %vm768_vm0, %v2612_v37  ;;  %v721_v48 = vld [vmem:[%s2608_s21 + $0x28] sm:$0x1]  ;;  %v932_v49 = vrot.slane %v2641_v45, 1  ;;  %v2647_v50 = vld [vmem:[%s2608_s21 + $0x40] sm:$0xff] }
  0x38   : > { %2126 = vmatprep.mubr.msk.f32.mxu0 %vm768_vm0, %v2615_v38  ;;  %2150 = vmatpush3.msra.mxu0 %v2023_v33  ;;  %v927_v51 = vrot.slane %v719_v47, 1  ;;  %v930_v52 = vrot.slane %v721_v48, 1  ;;  %v723_v53 = vld [vmem:[%s2608_s21 + $0x38] sm:$0x1]  ;;  %v935_v54 = vrot.slane %v2647_v50, 1  ;;  %v925_v55 = vsel %vm922_vm3, %v923_v40, %v924_v46  ;;  %v2673_v0 = vld [vmem:[%s2608_s21 + $0x50] sm:$0xff] }
  0x39   : > { %2177 = vmatprep.subr.mxu0 %v2631_v41  ;;  %v933_v56 = vrot.slane %v723_v53, 1  ;;  %v725_v57 = vld [vmem:[%s2608_s21 + $0x48] sm:$0x1]  ;;  %v727_v58 = vld [vmem:[%s2608_s21 + $0x58] sm:$0x1]  ;;  %2137 = vmatprep.mubr.msk.f32.mxu1 %vm750_vm2, %v925_v55  ;;  %v938_v1 = vrot.slane %v2673_v0, 1 }
  0x3a   : > { %v2659_v59 = vsel %vm922_vm3, %v926_v42, %v927_v51  ;;  %v2662_v60 = vsel %vm922_vm3, %v929_v43, %v930_v52  ;;  %v936_v61 = vrot.slane %v725_v57, 1  ;;  %v729_v62 = vld [vmem:[%s2608_s21 + $0x68] sm:$0x1]  ;;  %v2679_v2 = vld [vmem:[%s2608_s21 + $0x60] sm:$0xff]  ;;  %v939_v4 = vrot.slane %v727_v58, 1  ;;  %v2704_v10 = vld [vmem:[%s2608_s21 + $0x70] sm:$0xff] }
  0x3b   : > { %2127 = vmatmul.mubr.msk.f32.gmra.mxu0 %vm768_vm0, %v2641_v45  ;;  %v2668_v63 = vld [vmem:[%s2902_s4 + $0x8] sm:$0xf]  ;;  %2138 = vmatmul.mubr.msk.f32.vlgmr.msra.gmra.mxu1 %vm750_vm2, %v2659_v59  ;;  %v2684_v3 = vsel %vm922_vm3, %v932_v49, %v933_v56  ;;  %v941_v5 = vrot.slane %v2679_v2, 1  ;;  %v942_v7 = vrot.slane %v729_v62, 1  ;;  %v731_v8 = vld [vmem:[%s2608_s21 + $0x78] sm:$0x1] }
  0x3c   : > { %2129 = vmatprep.mubr.msk.f32.mxu0 %vm768_vm0, %v2647_v50  ;;  %2140 = vmatprep.mubr.msk.f32.mxu1 %vm750_vm2, %v2662_v60  ;;  %v2689_v6 = vsel %vm922_vm3, %v935_v54, %v936_v61  ;;  %v733_v9 = vld [vmem:[%s2698_s29 + $0x8] sm:$0x1]  ;;  %v944_v11 = vrot.slane %v2704_v10, 1  ;;  %v2712_v12 = vsel %vm922_vm3, %v938_v1, %v939_v4  ;;  %v732_v13 = vld [vmem:[%s2698_s29] sm:$0xff]  ;;  %v945_v14 = vrot.slane %v731_v8, 1  ;;  %s2915_s23 = smov (!%p695_p11, %s2375_s23), 1 }
  0x3d   : > { %2164 = vmatpush3.msk.msra.mxu1 %vm972_vm1, %v2032_v35  ;;  %v1260_v15 = vrot.slane %v732_v13, 1  ;;  %v2716_v16 = vsel %vm922_vm3, %v941_v5, %v942_v7  ;;  %v1261_v17 = vrot.slane %v733_v9, 1  ;;  %v735_v18 = vld [vmem:[%s2698_s29 + $0x18] sm:$0x1]  ;;  %v737_v19 = vld [vmem:[%s2698_s29 + $0x28] sm:$0x1] }
  0x3e   : > { %2191 = vmatprep.subr.msk.mxu1 %vm972_vm1, %v2668_v63  ;;  %v734_v20 = vld [vmem:[%s2698_s29 + $0x10] sm:$0xff]  ;;  %v2734_v22 = vsel %vm922_vm3, %v944_v11, %v945_v14  ;;  %v736_v23 = vld [vmem:[%s2698_s29 + $0x20] sm:$0xff]  ;;  %v1264_v24 = vrot.slane %v735_v18, 1  ;;  %v1267_v27 = vrot.slane %v737_v19, 1  ;;  %v739_v28 = vld [vmem:[%s2698_s29 + $0x38] sm:$0x1] }
  0x3f   : > { %2130 = vmatmul.mubr.msk.f32.gmra.mxu0 %vm768_vm0, %v2673_v0  ;;  %2141 = vmatmul.mubr.msk.f32.gmra.mxu1 %vm750_vm2, %v2684_v3  ;;  %v1263_v21 = vrot.slane %v734_v20, 1  ;;  %v1266_v25 = vrot.slane %v736_v23, 1  ;;  %v1262_v26 = vsel %vm922_vm3, %v1260_v15, %v1261_v17  ;;  %v741_v29 = vld [vmem:[%s2698_s29 + $0x48] sm:$0x1]  ;;  %v738_v30 = vld [vmem:[%s2698_s29 + $0x30] sm:$0xff]  ;;  %v740_v32 = vld [vmem:[%s2698_s29 + $0x40] sm:$0xff] }
  0x40   : > { %2132 = vmatprep.mubr.msk.f32.mxu0 %vm768_vm0, %v2679_v2  ;;  %2143 = vmatprep.mubr.msk.f32.mxu1 %vm750_vm2, %v2689_v6  ;;  %v1269_v31 = vrot.slane %v738_v30, 1  ;;  %v1270_v34 = vrot.slane %v739_v28, 1  ;;  %v1272_v35 = vrot.slane %v740_v32, 1  ;;  %v1273_v39 = vrot.slane %v741_v29, 1  ;;  %v743_v40 = vld [vmem:[%s2698_s29 + $0x58] sm:$0x1] }
  0x41   : > { %v1265_v33 = vsel %vm922_vm3, %v1263_v21, %v1264_v24  ;;  %v1268_v36 = vsel %vm922_vm3, %v1266_v25, %v1267_v27  ;;  %v745_v42 = vld [vmem:[%s2698_s29 + $0x68] sm:$0x1]  ;;  %v742_v43 = vld [vmem:[%s2698_s29 + $0x50] sm:$0xff]  ;;  %v744_v44 = vld [vmem:[%s2698_s29 + $0x60] sm:$0xff]  ;;  %v1276_v47 = vrot.slane %v743_v40, 1  ;;  %s2207_s7 = smul.u32 288, %s2915_s23 }
  0x42   : > { %v1271_v46 = vsel %vm922_vm3, %v1269_v31, %v1270_v34  ;;  %v1278_v48 = vrot.slane %v744_v44, 1  ;;  %v1274_v49 = vsel %vm922_vm3, %v1272_v35, %v1273_v39  ;;  %v1279_v51 = vrot.slane %v745_v42, 1  ;;  %v747_v52 = vld [vmem:[%s2698_s29 + $0x78] sm:$0x1]  ;;  %v746_v53 = vld [vmem:[%s2698_s29 + $0x70] sm:$0xff]  ;;  %v759_v62 = vld [vmem:[#allocation2] sm:$0xff] }
  0x43   : > { %2133 = vmatmul.mubr.msk.f32.gmra.mxu0 %vm768_vm0, %v2704_v10  ;;  %2144 = vmatmul.mubr.msk.f32.gmra.mxu1 %vm750_vm2, %v2712_v12  ;;  %v1281_v54 = vrot.slane %v746_v53, 1  ;;  %v1282_v56 = vrot.slane %v747_v52, 1  ;;  %s2065_s27 = sadd.s32 256, %s2207_s7  ;;  %v762_v1 = vld [vmem:[#allocation2 + $0x18] sm:$0xff]  ;;  %v761_v4 = vld [vmem:[#allocation2 + $0x10] sm:$0xff]  ;;  %v764_v8 = vld [vmem:[#allocation2 + $0x28] sm:$0xff] }
  0x44   : > { %2151 = vmatprep.mubr.msk.f32.mxu0 %vm768_vm0, %v732_v13  ;;  %2146 = vmatprep.mubr.msk.f32.mxu1 %vm750_vm2, %v2716_v16  ;;  %v1280_v57 = vsel %vm922_vm3, %v1278_v48, %v1279_v51  ;;  %s703_s10 = scalar_lea.vmem %s2900_s2, %s2065_s27  ;;  %v766_v17 = vld [vmem:[#allocation2 + $0x38] sm:$0xff]  ;;  %s2066_s11 = sshll.u32 %s2915_s23, 6 }
  0x45   : > { %v1283_v58 = vsel %vm922_vm3, %v1281_v54, %v1282_v56  ;;  %s2861_s16 = scalar_lea.vmem %s2904_s6, %s2066_s11 }
  0x47   : > { %2152 = vmatmul.mubr.msk.f32.vlgmr.msra.gmra.mxu0 %vm768_vm0, %v734_v20  ;;  %2147 = vmatmul.mubr.msk.f32.gmra.mxu1 %vm750_vm2, %v2734_v22 }
  0x48   : > { %2154 = vmatprep.mubr.msk.f32.mxu0 %vm768_vm0, %v736_v23  ;;  %2178 = vmatpush3.msra.mxu0 %v2631_v41  ;;  %v1275_v41 = vrot.slane %v742_v43, 1  ;;  %v765_v23 = vld [vmem:[#allocation2 + $0x30] sm:$0xff] }
  0x49   : > { %2165 = vmatprep.mubr.msk.f32.mxu1 %vm750_vm2, %v1262_v26 }
  0x4a   : > { %v1277_v55 = vsel %vm922_vm3, %v1275_v41, %v1276_v47 }
  0x4b   : > { %2155 = vmatmul.mubr.msk.f32.gmra.mxu0 %vm768_vm0, %v738_v30  ;;  %2166 = vmatmul.mubr.msk.f32.vlgmr.msra.gmra.mxu1 %vm750_vm2, %v1265_v33 }
  0x4c   : > { %2157 = vmatprep.mubr.msk.f32.mxu0 %vm768_vm0, %v740_v32  ;;  %2168 = vmatprep.mubr.msk.f32.mxu1 %vm750_vm2, %v1268_v36 }
  0x4d   : > { %2192 = vmatpush3.msk.msra.mxu1 %vm972_vm1, %v2668_v63 }
  0x4f   : > { %2158 = vmatmul.mubr.msk.f32.gmra.mxu0 %vm768_vm0, %v742_v43  ;;  %2169 = vmatmul.mubr.msk.f32.gmra.mxu1 %vm750_vm2, %v1271_v46 }
  0x50   : > { %2160 = vmatprep.mubr.msk.f32.mxu0 %vm768_vm0, %v744_v44  ;;  %2171 = vmatprep.mubr.msk.f32.mxu1 %vm750_vm2, %v1274_v49 }
  0x53   : > { %2161 = vmatmul.mubr.msk.f32.gmra.mxu0 %vm768_vm0, %v746_v53  ;;  %2172 = vmatmul.mubr.msk.f32.gmra.mxu1 %vm750_vm2, %v1277_v55 }
  0x54   : > { %2179 = vmatprep.mubr.msk.f32.mxu0 %vm768_vm0, %v2612_v37  ;;  %2174 = vmatprep.mubr.msk.f32.mxu1 %vm750_vm2, %v1280_v57  ;;  %v749_v37 = vld [vmem:[%s703_s10 + $0x8] sm:$0x1] }
  0x57   : > { %2180 = vmatmul.mubr.msk.f32.vlgmr.msra.gmra.mxu0 %vm768_vm0, %v2615_v38  ;;  %2175 = vmatmul.mubr.msk.f32.gmra.mxu1 %vm750_vm2, %v1283_v58  ;;  %v748_v38 = vld [vmem:[%s703_s10] sm:$0xff] }
  0x58   : > { %2182 = vmatprep.mubr.msk.f32.mxu0 %vm768_vm0, %v2641_v45  ;;  %2193 = vmatprep.mubr.msk.f32.mxu1 %vm750_vm2, %v2659_v59  ;;  %v1569_v45 = vrot.slane %v748_v38, 1 }
  0x5b   : > { %2183 = vmatmul.mubr.msk.f32.gmra.mxu0 %vm768_vm0, %v2647_v50  ;;  %2194 = vmatmul.mubr.msk.f32.vlgmr.msra.gmra.mxu1 %vm750_vm2, %v2662_v60  ;;  %v1570_v50 = vrot.slane %v749_v37, 1  ;;  %v760_v60 = vld [vmem:[#allocation2 + $0x8] sm:$0xff] }
  0x5c   : > { %2185 = vmatprep.mubr.msk.f32.mxu0 %vm768_vm0, %v2673_v0  ;;  %2196 = vmatprep.mubr.msk.f32.mxu1 %vm750_vm2, %v2684_v3 }
  0x5d   : > { %v1571_v59 = vsel %vm922_vm3, %v1569_v45, %v1570_v50 }
  0x5f   : > { %2186 = vmatmul.mubr.msk.f32.gmra.mxu0 %vm768_vm0, %v2679_v2  ;;  %2197 = vmatmul.mubr.msk.f32.gmra.mxu1 %vm750_vm2, %v2689_v6 }
  0x60   : > { %2188 = vmatprep.mubr.msk.f32.mxu0 %vm768_vm0, %v2704_v10  ;;  %2199 = vmatprep.mubr.msk.f32.mxu1 %vm750_vm2, %v2712_v12  ;;  %v763_v12 = vld [vmem:[#allocation2 + $0x20] sm:$0xff] }
  0x63   : > { %2189 = vmatmul.mubr.msk.f32.gmra.mxu0 %vm768_vm0, %v748_v38  ;;  %2200 = vmatmul.mubr.msk.f32.gmra.mxu1 %vm750_vm2, %v2716_v16 }
  0x64   : > { %2202 = vmatprep.mubr.msk.f32.mxu1 %vm750_vm2, %v2734_v22 }
  0x67   : > { %2203 = vmatmul.mubr.msk.f32.gmra.mxu1 %vm750_vm2, %v1571_v59 }
  0xf7   : > { %v2125_v61 = vpop.f32.mrf.mxu0 }
  0xf8   : > { %v899_v63 = vadd.f32 %v2125_v61, %v760_v60 }
  0xf9   : > { %v859_v0 = vpop.f32.mrf.mxu0 }
  0xfa   : > { %907 = vst.msk [vmem:[#allocation2 + $0x8] sm:$0xff] %vm750_vm2, %v899_v63  ;;  %v898_v2 = vadd.f32 %v859_v0, %v759_v62 }
  0xfb   : > { %v2128_v3 = vpop.f32.mrf.mxu0  ;;  %v2139_v6 = vpop.f32.mrf.mxu1 }
  0xfc   : > { %906 = vst.msk [vmem:[#allocation2] sm:$0xff] %vm750_vm2, %v898_v2  ;;  %v901_v5 = vadd.f32 %v2128_v3, %v762_v1 }
  0xfd   : > { %v869_v7 = vpop.f32.mrf.mxu0  ;;  %v1042_v10 = vpop.f32.mrf.mxu1 }
  0xfe   : > { %909 = vst.msk [vmem:[#allocation2 + $0x18] sm:$0xff] %vm750_vm2, %v901_v5  ;;  %v900_v9 = vadd.f32 %v869_v7, %v761_v4 }
  0xff   : > { %v2131_v11 = vpop.f32.mrf.mxu0  ;;  %v2142_v14 = vpop.f32.mrf.mxu1 }
 0x100   : > { %908 = vst.msk [vmem:[#allocation2 + $0x10] sm:$0xff] %vm750_vm2, %v900_v9  ;;  %v903_v13 = vadd.f32 %v2131_v11, %v764_v8 }
 0x101   : > { %v948_v15 = vld [vmem:[#allocation2 + $0x8] sm:$0xff]  ;;  %v879_v16 = vpop.f32.mrf.mxu0  ;;  %v1052_v20 = vpop.f32.mrf.mxu1 }
 0x102   : > { %911 = vst.msk [vmem:[#allocation2 + $0x28] sm:$0xff] %vm750_vm2, %v903_v13  ;;  %v1082_v18 = vadd.f32 %v2139_v6, %v948_v15  ;;  %v902_v19 = vadd.f32 %v879_v16, %v763_v12 }
 0x103   : > { %v947_v21 = vld [vmem:[#allocation2] sm:$0xff]  ;;  %v2134_v22 = vpop.f32.mrf.mxu0  ;;  %v2145_v26 = vpop.f32.mrf.mxu1 }
 0x104   : > { %1090 = vst.msk [vmem:[#allocation2 + $0x8] sm:$0xff] %vm750_vm2, %v1082_v18  ;;  %910 = vst.msk [vmem:[#allocation2 + $0x20] sm:$0xff] %vm750_vm2, %v902_v19  ;;  %v1081_v24 = vadd.f32 %v1042_v10, %v947_v21  ;;  %v905_v25 = vadd.f32 %v2134_v22, %v766_v17 }
 0x105   : > { %v950_v27 = vld [vmem:[#allocation2 + $0x18] sm:$0xff]  ;;  %v889_v28 = vpop.f32.mrf.mxu0  ;;  %v1062_v31 = vpop.f32.mrf.mxu1 }
 0x106   : > { %1089 = vst.msk [vmem:[#allocation2] sm:$0xff] %vm750_vm2, %v1081_v24  ;;  %913 = vst.msk [vmem:[#allocation2 + $0x38] sm:$0xff] %vm750_vm2, %v905_v25  ;;  %v1084_v29 = vadd.f32 %v2142_v14, %v950_v27  ;;  %v904_v30 = vadd.f32 %v889_v28, %v765_v23 }
 0x107   : > { %v949_v32 = vld [vmem:[#allocation2 + $0x10] sm:$0xff]  ;;  %v2153_v33 = vpop.f32.mrf.mxu0  ;;  %v2148_v35 = vpop.f32.mrf.mxu1 }
 0x108   : > { %1092 = vst.msk [vmem:[#allocation2 + $0x18] sm:$0xff] %vm750_vm2, %v1084_v29  ;;  %912 = vst.msk [vmem:[#allocation2 + $0x30] sm:$0xff] %vm750_vm2, %v904_v30  ;;  %v1083_v34 = vadd.f32 %v1052_v20, %v949_v32 }
 0x109   : > { %v952_v36 = vld [vmem:[#allocation2 + $0x28] sm:$0xff]  ;;  %v1197_v39 = vpop.f32.mrf.mxu0  ;;  %v1072_v42 = vpop.f32.mrf.mxu1 }
 0x10a   : > { %1091 = vst.msk [vmem:[#allocation2 + $0x10] sm:$0xff] %vm750_vm2, %v1083_v34  ;;  %v1086_v40 = vadd.f32 %v2145_v26, %v952_v36 }
 0x10b   : > { %v951_v43 = vld [vmem:[#allocation2 + $0x20] sm:$0xff]  ;;  %v1098_v41 = vld [vmem:[#allocation2 + $0x8] sm:$0xff]  ;;  %v2156_v44 = vpop.f32.mrf.mxu0  ;;  %v2167_v48 = vpop.f32.mrf.mxu1 }
 0x10c   : > { %1094 = vst.msk [vmem:[#allocation2 + $0x28] sm:$0xff] %vm750_vm2, %v1086_v40  ;;  %v1085_v46 = vadd.f32 %v1062_v31, %v951_v43  ;;  %v1237_v47 = vadd.f32 %v2153_v33, %v1098_v41 }
 0x10d   : > { %v954_v49 = vld [vmem:[#allocation2 + $0x38] sm:$0xff]  ;;  %v1097_v51 = vld [vmem:[#allocation2] sm:$0xff]  ;;  %v1207_v52 = vpop.f32.mrf.mxu0  ;;  %v1379_v55 = vpop.f32.mrf.mxu1 }
 0x10e   : > { %1093 = vst.msk [vmem:[#allocation2 + $0x20] sm:$0xff] %vm750_vm2, %v1085_v46  ;;  %1245 = vst.msk [vmem:[#allocation2 + $0x8] sm:$0xff] %vm750_vm2, %v1237_v47  ;;  %v1088_v53 = vadd.f32 %v2148_v35, %v954_v49  ;;  %v1236_v54 = vadd.f32 %v1197_v39, %v1097_v51 }
 0x10f   : > { %v953_v56 = vld [vmem:[#allocation2 + $0x30] sm:$0xff]  ;;  %v1100_v57 = vld [vmem:[#allocation2 + $0x18] sm:$0xff]  ;;  %v2159_v58 = vpop.f32.mrf.mxu0  ;;  %v2170_v45 = vpop.f32.mrf.mxu1 }
 0x110   : > { %1096 = vst.msk [vmem:[#allocation2 + $0x38] sm:$0xff] %vm750_vm2, %v1088_v53  ;;  %1244 = vst.msk [vmem:[#allocation2] sm:$0xff] %vm750_vm2, %v1236_v54  ;;  %v1087_v37 = vadd.f32 %v1072_v42, %v953_v56  ;;  %v1239_v38 = vadd.f32 %v2156_v44, %v1100_v57 }
 0x111   : > { %v1099_v50 = vld [vmem:[#allocation2 + $0x10] sm:$0xff]  ;;  %v1217_v59 = vpop.f32.mrf.mxu0  ;;  %v1389_v61 = vpop.f32.mrf.mxu1 }
 0x112   : > { %1095 = vst.msk [vmem:[#allocation2 + $0x30] sm:$0xff] %vm750_vm2, %v1087_v37  ;;  %1247 = vst.msk [vmem:[#allocation2 + $0x18] sm:$0xff] %vm750_vm2, %v1239_v38  ;;  %v1238_v60 = vadd.f32 %v1207_v52, %v1099_v50 }
 0x113   : > { %v1102_v62 = vld [vmem:[#allocation2 + $0x28] sm:$0xff]  ;;  %v2162_v63 = vpop.f32.mrf.mxu0  ;;  %v2173_v1 = vpop.f32.mrf.mxu1 }
 0x114   : > { %1246 = vst.msk [vmem:[#allocation2 + $0x10] sm:$0xff] %vm750_vm2, %v1238_v60  ;;  %v1241_v0 = vadd.f32 %v2159_v58, %v1102_v62 }
 0x115   : > { %v1101_v2 = vld [vmem:[#allocation2 + $0x20] sm:$0xff]  ;;  %v1285_v3 = vld [vmem:[#allocation2 + $0x8] sm:$0xff]  ;;  %v1227_v4 = vpop.f32.mrf.mxu0  ;;  %v1399_v7 = vpop.f32.mrf.mxu1 }
 0x116   : > { %1249 = vst.msk [vmem:[#allocation2 + $0x28] sm:$0xff] %vm750_vm2, %v1241_v0  ;;  %v1240_v5 = vadd.f32 %v1217_v59, %v1101_v2  ;;  %v1419_v6 = vadd.f32 %v2167_v48, %v1285_v3  ;;  %v2061_v2 = vld [vmem:[%s2903_s5] ss:$0 sm:$0xff] }
 0x117   : > { %v1104_v8 = vld [vmem:[#allocation2 + $0x38] sm:$0xff]  ;;  %v1284_v9 = vld [vmem:[#allocation2] sm:$0xff]  ;;  %v2181_v10 = vpop.f32.mrf.mxu0  ;;  %v2176_v13 = vpop.f32.mrf.mxu1 }
 0x118   : > { %1248 = vst.msk [vmem:[#allocation2 + $0x20] sm:$0xff] %vm750_vm2, %v1240_v5  ;;  %1427 = vst.msk [vmem:[#allocation2 + $0x8] sm:$0xff] %vm750_vm2, %v1419_v6  ;;  %v1243_v11 = vadd.f32 %v2162_v63, %v1104_v8  ;;  %v1418_v12 = vadd.f32 %v1379_v55, %v1284_v9 }
 0x119   : > { %v1103_v14 = vld [vmem:[#allocation2 + $0x30] sm:$0xff]  ;;  %v1287_v15 = vld [vmem:[#allocation2 + $0x18] sm:$0xff]  ;;  %v1513_v16 = vpop.f32.mrf.mxu0  ;;  %v1409_v19 = vpop.f32.mrf.mxu1 }
 0x11a   : > { %1251 = vst.msk [vmem:[#allocation2 + $0x38] sm:$0xff] %vm750_vm2, %v1243_v11  ;;  %1426 = vst.msk [vmem:[#allocation2] sm:$0xff] %vm750_vm2, %v1418_v12  ;;  %v1242_v17 = vadd.f32 %v1227_v4, %v1103_v14  ;;  %v1421_v18 = vadd.f32 %v2170_v45, %v1287_v15 }
 0x11b   : > { %v1286_v20 = vld [vmem:[#allocation2 + $0x10] sm:$0xff]  ;;  %v2184_v21 = vpop.f32.mrf.mxu0  ;;  %v2195_v23 = vpop.f32.mrf.mxu1 }
 0x11c   : > { %1250 = vst.msk [vmem:[#allocation2 + $0x30] sm:$0xff] %vm750_vm2, %v1242_v17  ;;  %1429 = vst.msk [vmem:[#allocation2 + $0x18] sm:$0xff] %vm750_vm2, %v1421_v18  ;;  %v1420_v22 = vadd.f32 %v1389_v61, %v1286_v20 }
 0x11d   : > { %v1289_v24 = vld [vmem:[#allocation2 + $0x28] sm:$0xff]  ;;  %v1523_v25 = vpop.f32.mrf.mxu0  ;;  %v1653_v29 = vpop.f32.mrf.mxu1 }
 0x11e   : > { %1428 = vst.msk [vmem:[#allocation2 + $0x10] sm:$0xff] %vm750_vm2, %v1420_v22  ;;  %v1423_v26 = vadd.f32 %v2173_v1, %v1289_v24 }
 0x11f   : > { %v1288_v27 = vld [vmem:[#allocation2 + $0x20] sm:$0xff]  ;;  %v1435_v28 = vld [vmem:[#allocation2 + $0x8] sm:$0xff]  ;;  %v2187_v34 = vpop.f32.mrf.mxu0  ;;  %v2198_v42 = vpop.f32.mrf.mxu1 }
 0x120   : > { %1431 = vst.msk [vmem:[#allocation2 + $0x28] sm:$0xff] %vm750_vm2, %v1423_v26  ;;  %v1422_v30 = vadd.f32 %v1399_v7, %v1288_v27  ;;  %v1553_v31 = vadd.f32 %v2181_v10, %v1435_v28 }
 0x121   : > { %v1291_v32 = vld [vmem:[#allocation2 + $0x38] sm:$0xff]  ;;  %v1434_v33 = vld [vmem:[#allocation2] sm:$0xff]  ;;  %v1533_v46 = vpop.f32.mrf.mxu0  ;;  %v1663_v49 = vpop.f32.mrf.mxu1 }
 0x122   : > { %1430 = vst.msk [vmem:[#allocation2 + $0x20] sm:$0xff] %vm750_vm2, %v1422_v30  ;;  %1561 = vst.msk [vmem:[#allocation2 + $0x8] sm:$0xff] %vm750_vm2, %v1553_v31  ;;  %v1425_v35 = vadd.f32 %v2176_v13, %v1291_v32  ;;  %v1552_v36 = vadd.f32 %v1513_v16, %v1434_v33 }
 0x123   : > { %v1290_v39 = vld [vmem:[#allocation2 + $0x30] sm:$0xff]  ;;  %v1437_v40 = vld [vmem:[#allocation2 + $0x18] sm:$0xff]  ;;  %v2190_v54 = vpop.f32.mrf.mxu0  ;;  %v2201_v37 = vpop.f32.mrf.mxu1 }
 0x124   : > { %1433 = vst.msk [vmem:[#allocation2 + $0x38] sm:$0xff] %vm750_vm2, %v1425_v35  ;;  %1560 = vst.msk [vmem:[#allocation2] sm:$0xff] %vm750_vm2, %v1552_v36  ;;  %v1424_v43 = vadd.f32 %v1409_v19, %v1290_v39  ;;  %v1555_v41 = vadd.f32 %v2184_v21, %v1437_v40 }
 0x125   : > { %v1436_v44 = vld [vmem:[#allocation2 + $0x10] sm:$0xff]  ;;  %v1543_v59 = vpop.f32.mrf.mxu0  ;;  %v1673_v0 = vpop.f32.mrf.mxu1 }
 0x126   : > { %1432 = vst.msk [vmem:[#allocation2 + $0x30] sm:$0xff] %vm750_vm2, %v1424_v43  ;;  %1563 = vst.msk [vmem:[#allocation2 + $0x18] sm:$0xff] %vm750_vm2, %v1555_v41  ;;  %v1554_v47 = vadd.f32 %v1523_v25, %v1436_v44 }
 0x127   : > { %v1439_v48 = vld [vmem:[#allocation2 + $0x28] sm:$0xff]  ;;  %v2204_v7 = vpop.f32.mrf.mxu1 }
 0x128   : > { %1562 = vst.msk [vmem:[#allocation2 + $0x10] sm:$0xff] %vm750_vm2, %v1554_v47  ;;  %v1557_v51 = vadd.f32 %v2187_v34, %v1439_v48 }
 0x129   : > { %v1438_v52 = vld [vmem:[#allocation2 + $0x20] sm:$0xff]  ;;  %v1573_v53 = vld [vmem:[#allocation2 + $0x8] sm:$0xff]  ;;  %v1683_v16 = vpop.f32.mrf.mxu1 }
 0x12a   : > { %1565 = vst.msk [vmem:[#allocation2 + $0x28] sm:$0xff] %vm750_vm2, %v1557_v51  ;;  %v1556_v55 = vadd.f32 %v1533_v46, %v1438_v52  ;;  %v1693_v56 = vadd.f32 %v2195_v23, %v1573_v53 }
 0x12b   : > { %v1441_v57 = vld [vmem:[#allocation2 + $0x38] sm:$0xff]  ;;  %v1572_v58 = vld [vmem:[#allocation2] sm:$0xff] }
 0x12c   : > { %1564 = vst.msk [vmem:[#allocation2 + $0x20] sm:$0xff] %vm750_vm2, %v1556_v55  ;;  %1701 = vst.msk [vmem:[#allocation2 + $0x8] sm:$0xff] %vm750_vm2, %v1693_v56  ;;  %v1559_v38 = vadd.f32 %v2190_v54, %v1441_v57  ;;  %v1692_v45 = vadd.f32 %v1653_v29, %v1572_v58 }
 0x12d   : > { %v1440_v50 = vld [vmem:[#allocation2 + $0x30] sm:$0xff]  ;;  %v1575_v60 = vld [vmem:[#allocation2 + $0x18] sm:$0xff] }
 0x12e   : > { %1567 = vst.msk [vmem:[#allocation2 + $0x38] sm:$0xff] %vm750_vm2, %v1559_v38  ;;  %1700 = vst.msk [vmem:[#allocation2] sm:$0xff] %vm750_vm2, %v1692_v45  ;;  %v1558_v61 = vadd.f32 %v1543_v59, %v1440_v50  ;;  %v1695_v62 = vadd.f32 %v2198_v42, %v1575_v60 }
 0x12f   : > { %v1574_v63 = vld [vmem:[#allocation2 + $0x10] sm:$0xff] }
 0x130   : > { %1566 = vst.msk [vmem:[#allocation2 + $0x30] sm:$0xff] %vm750_vm2, %v1558_v61  ;;  %1703 = vst.msk [vmem:[#allocation2 + $0x18] sm:$0xff] %vm750_vm2, %v1695_v62  ;;  %v1694_v1 = vadd.f32 %v1663_v49, %v1574_v63 }
 0x131   : > { %v1577_v3 = vld [vmem:[#allocation2 + $0x28] sm:$0xff] }
 0x132   : > { %1702 = vst.msk [vmem:[#allocation2 + $0x10] sm:$0xff] %vm750_vm2, %v1694_v1  ;;  %v1697_v4 = vadd.f32 %v2201_v37, %v1577_v3 }
 0x133   : > { %v1709_v5 = vld [vmem:[#allocation2 + $0x8] sm:$0xff]  ;;  %v1576_v6 = vld [vmem:[#allocation2 + $0x20] sm:$0xff] }
 0x134   : > { %v1724_v8 = vadd.f32 %v2061_v2, %v1709_v5  ;;  %1705 = vst.msk [vmem:[#allocation2 + $0x28] sm:$0xff] %vm750_vm2, %v1697_v4  ;;  %v1696_v9 = vadd.f32 %v1673_v0, %v1576_v6 }
 0x135   : > { %v1708_v10 = vld [vmem:[#allocation2] sm:$0xff]  ;;  %v1579_v11 = vld [vmem:[#allocation2 + $0x38] sm:$0xff] }
 0x136   : > { %1732 = vst.msk [vmem:[%s2861_s16 + $0x8] sm:$0xff] %vm750_vm2, %v1724_v8  ;;  %v1723_v12 = vadd.f32 %v2061_v2, %v1708_v10  ;;  %1704 = vst.msk [vmem:[#allocation2 + $0x20] sm:$0xff] %vm750_vm2, %v1696_v9  ;;  %v1699_v13 = vadd.f32 %v2204_v7, %v1579_v11 }
 0x137   : > { %v1711_v14 = vld [vmem:[#allocation2 + $0x18] sm:$0xff]  ;;  %v1578_v15 = vld [vmem:[#allocation2 + $0x30] sm:$0xff] }
 0x138   : > { %1731 = vst.msk [vmem:[%s2861_s16] sm:$0xff] %vm750_vm2, %v1723_v12  ;;  %v1726_v17 = vadd.f32 %v2061_v2, %v1711_v14  ;;  %1707 = vst.msk [vmem:[#allocation2 + $0x38] sm:$0xff] %vm750_vm2, %v1699_v13  ;;  %v1698_v18 = vadd.f32 %v1683_v16, %v1578_v15 }
 0x139   : > { %v1710_v19 = vld [vmem:[#allocation2 + $0x10] sm:$0xff] }
 0x13a   : > { %1734 = vst.msk [vmem:[%s2861_s16 + $0x18] sm:$0xff] %vm750_vm2, %v1726_v17  ;;  %v1725_v20 = vadd.f32 %v2061_v2, %v1710_v19  ;;  %1706 = vst.msk [vmem:[#allocation2 + $0x30] sm:$0xff] %vm750_vm2, %v1698_v18 }
 0x13b   : > { %v1713_v21 = vld [vmem:[#allocation2 + $0x28] sm:$0xff] }
 0x13c   : > { %1733 = vst.msk [vmem:[%s2861_s16 + $0x10] sm:$0xff] %vm750_vm2, %v1725_v20  ;;  %v1728_v22 = vadd.f32 %v2061_v2, %v1713_v21 }
 0x13d   : > { %v1712_v23 = vld [vmem:[#allocation2 + $0x20] sm:$0xff] }
 0x13e   : > { %1736 = vst.msk [vmem:[%s2861_s16 + $0x28] sm:$0xff] %vm750_vm2, %v1728_v22  ;;  %v1727_v24 = vadd.f32 %v2061_v2, %v1712_v23 }
 0x13f   : > { %v1715_v25 = vld [vmem:[#allocation2 + $0x38] sm:$0xff] }
 0x140   : > { %1735 = vst.msk [vmem:[%s2861_s16 + $0x20] sm:$0xff] %vm750_vm2, %v1727_v24  ;;  %v1730_v26 = vadd.f32 %v2061_v2, %v1715_v25 }
 0x141   : > { %v1714_v27 = vld [vmem:[#allocation2 + $0x30] sm:$0xff] }
 0x142   : > { %1738 = vst.msk [vmem:[%s2861_s16 + $0x38] sm:$0xff] %vm750_vm2, %v1730_v26  ;;  %v1729_v28 = vadd.f32 %v2061_v2, %v1714_v27 }
 0x144   : > { %1737 = vst.msk [vmem:[%s2861_s16 + $0x30] sm:$0xff] %vm750_vm2, %v1729_v28 }
 0x145 PF: > { %s16_s25 = sadd.s32 1, %s2383_s25   ;;  %s2908_s21 = smov %s2371_s22 }
 0x146   : > { %p13_p12 = scmp.ge.s32.totalorder %s16_s25, 4   ;;  %s2909_s22 = smov %s2472_s30 }
 0x147   : > { %s2910_s23 = smov %s2379_s24  ;;  %s2911_s24 = smov %s2913_s26 }
 0x148   :  { %15 = sbr.rel (!%p13_p12) target bundleno = 3 (0x3), region = 258 }

</bundles_post_ra>
